<compile_context>
chip_gen: v5e
topology: v5e:2x2
jax: 0.10.0
libtpu: 0.0.40
codegen_flags: <defaults>
</compile_context>

<pallas_src>
import functools

import jax
import jax.numpy as jnp
from jax.experimental import pallas as pl
from jax.experimental.pallas import tpu as pltpu


def _dsnt_kernel(x_ref, p_ref, o_ref):
    # x_ref: (TM, HW)  heatmap rows
    # p_ref: (HW, 2)   coordinate coefficients, columns = (py, px)
    # o_ref: (TM, 2)   expected coordinates per row, (y, x)
    o_ref[...] = jnp.dot(
        x_ref[...], p_ref[...], preferred_element_type=jnp.float32
    ).astype(o_ref.dtype)


def _round_up(a: int, b: int) -> int:
    return ((a + b - 1) // b) * b


@functools.partial(jax.jit, static_argnames=("resolution",))
def dsnt_forward(x, resolution):
    """x: (B, C, H, W). Returns ((B, C, 2) expected coords (y, x), None)."""
    H, W = resolution
    B, C = x.shape[0], x.shape[1]
    assert x.shape[2] == H and x.shape[3] == W
    M = B * C
    HW = H * W

    # Coefficient matrix P (HW, 2): column 0 = probs_y, column 1 = probs_x,
    # mirroring the torch module's linspace(-1, 1) grids.
    lin_x = jnp.linspace(-1.0, 1.0, W, dtype=jnp.float32)            # (W,)
    lin_y = jnp.linspace(-1.0, 1.0, H, dtype=jnp.float32)            # (H,)
    probs_x = jnp.tile(lin_x[None, :], (H, 1)).reshape(HW)           # (HW,)
    probs_y = jnp.tile(lin_y[:, None], (1, W)).reshape(HW)           # (HW,)
    p = jnp.stack((probs_y, probs_x), axis=-1).astype(x.dtype)       # (HW, 2)

    x_flat = x.reshape(M, HW)
    itemsize = jnp.dtype(x_flat.dtype).itemsize

    # Row-tile size: multiple of 8, capped so one x tile is <= ~8 MiB
    # (double-buffered -> <= 16 MiB, comfortably inside scoped VMEM on all
    # of v5e / v6e / v7x), and no larger than needed for small M.
    max_tm_by_vmem = max(8, ((8 * 1024 * 1024) // (HW * itemsize)) // 8 * 8)
    TM = min(512, max_tm_by_vmem, _round_up(M, 8))
    Mp = _round_up(M, TM)
    if Mp != M:
        x_flat = jnp.pad(x_flat, ((0, Mp - M), (0, 0)))

    grid = (Mp // TM,)

    cost = pl.CostEstimate(
        flops=2 * Mp * HW * 2,
        transcendentals=0,
        bytes_accessed=Mp * HW * itemsize + HW * 2 * itemsize + Mp * 2 * 4,
    )

    out = pl.pallas_call(
        _dsnt_kernel,
        out_shape=jax.ShapeDtypeStruct((Mp, 2), jnp.float32),
        grid_spec=pltpu.PrefetchScalarGridSpec(
            num_scalar_prefetch=0,
            grid=grid,
            in_specs=[
                pl.BlockSpec((TM, HW), lambda i: (i, 0)),
                pl.BlockSpec((HW, 2), lambda i: (0, 0)),   # resident across steps
            ],
            out_specs=pl.BlockSpec((TM, 2), lambda i: (i, 0)),
        ),
        compiler_params=pltpu.CompilerParams(
            dimension_semantics=("parallel",),
            vmem_limit_bytes=48 * 1024 * 1024,
        ),
        cost_estimate=cost,
    )(x_flat, p)

    return out[:M].reshape(B, C, 2), None


def _dsnt_reference(x, resolution):
    """Pure-JAX reference mirroring the PyTorch forward."""
    H, W = resolution
    lin_x = jnp.linspace(-1.0, 1.0, W, dtype=jnp.float32)
    lin_y = jnp.linspace(-1.0, 1.0, H, dtype=jnp.float32)
    probs_x = jnp.tile(lin_x[None, :], (H, 1)).reshape(-1)
    probs_y = jnp.tile(lin_y[:, None], (1, W)).reshape(-1)
    xf = x.reshape(*x.shape[:-2], H * W).astype(jnp.float32)
    co_1 = (xf * probs_x).sum(-1)
    co_2 = (xf * probs_y).sum(-1)
    return jnp.stack((co_2, co_1), -1)


if __name__ == "__main__":
    key = jax.random.PRNGKey(0)
    B, C, H, W = 2, 4, 16, 16
    x = jax.random.uniform(key, (B, C, H, W), dtype=jnp.float32)
    # Normalize each heatmap like a typical DSNT input (softmax-like heatmap).
    x = x / x.sum(axis=(-2, -1), keepdims=True)

    coords, aux = dsnt_forward(x, (H, W))
    coords = jax.block_until_ready(coords)

    ref = _dsnt_reference(x, (H, W))
    assert coords.shape == (B, C, 2)
    assert aux is None
    assert jnp.allclose(coords, ref, atol=1e-5, rtol=1e-5)

    print("KERNEL_OK")
</pallas_src>

<mosaic_0001>
module attributes {stable_mosaic.version = 11 : i64} {
  func.func @_dsnt_kernel(%arg0: i32, %arg1: memref<8x256xf32, #tpu.memory_space<vmem>>, %arg2: memref<256x2xf32, #tpu.memory_space<vmem>>, %arg3: memref<8x2xf32, #tpu.memory_space<vmem>>) attributes {dimension_semantics = [#tpu.dimension_semantics<parallel>], iteration_bounds = array<i64: 1>, scalar_prefetch = 0 : i64, scratch_operands = 0 : i64, tpu.core_type = #tpu.core_type<tc>, window_params = [{transform_indices = @transform_0, window_bounds = array<i64: 8, 256>}, {pipeline_mode = #tpu.pipeline_mode<synchronous>, transform_indices = @transform_1, window_bounds = array<i64: 256, 2>}, {transform_indices = @transform_2, window_bounds = array<i64: 8, 2>}]} {
    %c0 = arith.constant 0 : index
    %c0_0 = arith.constant 0 : index
    %0 = vector.load %arg1[%c0, %c0_0] : memref<8x256xf32, #tpu.memory_space<vmem>>, vector<8x256xf32>
    %c0_1 = arith.constant 0 : index
    %c0_2 = arith.constant 0 : index
    %1 = vector.load %arg2[%c0_1, %c0_2] : memref<256x2xf32, #tpu.memory_space<vmem>>, vector<256x2xf32>
    %cst = arith.constant dense<0.000000e+00> : vector<8x2xf32>
    %2 = tpu.matmul %0, %1, %cst {dimension_numbers = #tpu.dot_dimension_numbers<[1], [0], [0], [1], [0, 0, 1, 1], [], []>} : vector<8x256xf32>, vector<256x2xf32>, vector<8x2xf32> -> vector<8x2xf32>
    %c0_3 = arith.constant 0 : index
    %c0_4 = arith.constant 0 : index
    %3 = vector.load %arg3[%c0_3, %c0_4] : memref<8x2xf32, #tpu.memory_space<vmem>>, vector<8x2xf32>
    tpu.vector_store %arg3[%c0_3, %c0_4], %2 {strides = array<i32>} : memref<8x2xf32, #tpu.memory_space<vmem>>, vector<8x2xf32>,
    return
  }
  func.func @transform_0(%arg0: i32) -> (i32, i32) {
    %c0_i32 = arith.constant 0 : i32
    %c0_i32_0 = arith.constant 0 : i32
    return %arg0, %c0_i32 : i32, i32
  }
  func.func @transform_1(%arg0: i32) -> (i32, i32) {
    %c0_i32 = arith.constant 0 : i32
    %c0_i32_0 = arith.constant 0 : i32
    %c0_i32_1 = arith.constant 0 : i32
    return %c0_i32, %c0_i32_0 : i32, i32
  }
  func.func @transform_2(%arg0: i32) -> (i32, i32) {
    %c0_i32 = arith.constant 0 : i32
    %c0_i32_0 = arith.constant 0 : i32
    return %arg0, %c0_i32 : i32, i32
  }
}

</mosaic_0001>

<bundles_post_ra>
// kernel: tile.10
= control target key start
LH: loop header
LB: loop body
LE: loop exit
PB: predicated region body
PF: predicated region fallthrough
CT: control target
= control target key end

     0   :  { %s28_s0 = inlined_call_operand.vmem [shape: f32[16], index: 0, kind: input, shape index: {}]   ;;  %s29_s1 = inlined_call_operand.vmem [shape: f32[16,1,1,16], index: 1, kind: output, shape index: {}]  }
   0x1   :  { %v4_v0 = vld [vmem:[%s28_s0] ss:$0 sm:$0xff] }
   0x2   :  { %5 = vst [vmem:[%s29_s1] sm:$0xff] %v4_v0 }
   0x3   :  { %8 = vst [vmem:[%s29_s1 + $0x8] sm:$0xff] %v4_v0 }

// kernel: tile.15
= control target key start
LH: loop header
LB: loop body
LE: loop exit
PB: predicated region body
PF: predicated region fallthrough
CT: control target
= control target key end

     0   :  { %s7_s6 = smov 3  ;;  %s21_s9 = smov 3  ;;  %vm4_vm0 = vcmask 130048   ;;  %vm11_vm1 = vcmask 1048448   ;;  %vm18_vm2 = vcmask 917248   ;;  %vm25_vm3 = vcmask 786048   ;;  %s129_s0 = inlined_call_operand.vmem [shape: f32[16,1,1,16], index: 0, kind: input, shape index: {}]   ;;  %s130_s1 = inlined_call_operand.vmem [shape: f32[256,1], index: 1, kind: output, shape index: {}]  }
   0x1   :  { %v67_v0 = vld [vmem:[%s129_s0 + $0x7] ss:$8 sm:%s7_s6]   ;;  %s82_s10 = smov 112   ;;  %v69_v1 = vld [vmem:[%s129_s0 + $0x5] ss:$8 sm:%s21_s9]   ;;  %s83_s13 = smov 80  }
   0x2   :  { %9 = vrot.lane.b32.xlu0 %v67_v0, %s82_s10  ;;  %23 = vrot.lane.b32.xlu1 %v69_v1, %s83_s13  ;;  %s14_s14 = smov 3  ;;  %s28_s15 = smov 3  ;;  %vm32_vm4 = vcmask 654848   ;;  %vm39_vm5 = vcmask 523648   ;;  %vm46_vm6 = vcmask 392448   ;;  %vm53_vm7 = vcmask 261248  }
   0x3   :  { %s35_s16 = smov 3  ;;  %v68_v3 = vld [vmem:[%s129_s0 + $0x6] ss:$8 sm:%s14_s14]   ;;  %s84_s21 = smov 48   ;;  %v70_v4 = vld [vmem:[%s129_s0 + $0x4] ss:$8 sm:%s28_s15]  }
   0x4   :  { %v71_v2 = vld [vmem:[%s129_s0 + $0x3] ss:$8 sm:%s35_s16]   ;;  %s42_s24 = smov 3  ;;  %s85_s25 = smov 96  }
   0x5   :  { %37 = vrot.lane.b32.xlu2 %v71_v2, %s84_s21  ;;  %s86_s26 = smov 64   ;;  %s49_s27 = smov 3  ;;  %v72_v5 = vld [vmem:[%s129_s0 + $0x2] ss:$8 sm:%s42_s24]  }
   0x6   :  { %v73_v6 = vld [vmem:[%s129_s0 + $0x1] ss:$8 sm:%s49_s27]   ;;  %s87_s3 = smov 32   ;;  %s88_s4 = smov 16  }
   0x7   :  { %s2_s5 = smov 3 }
   0x8   :  { %v3_v7 = vld [vmem:[%s129_s0] ss:$8 sm:%s2_s5]  }
   0x9   :  { %5 = vst.msk [vmem:[#allocation0] ss:$8 sm:$0x3] %vm4_vm0, %v3_v7  }
   0xa   :  { %16 = vrot.lane.b32.xlu0 %v68_v3, %s85_s25  ;;  %30 = vrot.lane.b32.xlu1 %v70_v4, %s86_s26 }
   0xd   :  { %44 = vrot.lane.b32.xlu2 %v72_v5, %s87_s3 }
  0x12   :  { %51 = vrot.lane.b32.xlu0 %v73_v6, %s88_s4 }
  0x5f   :  { %v38_v8 = vpop.permute.xlu2 %37  }
  0x67   :  { %v45_v9 = vpop.permute.xlu2 %44  }
  0x74   :  { %v10_v10 = vpop.permute.xlu0 %9   ;;  %v24_v11 = vpop.permute.xlu1 %23  }
  0x75   :  { %12 = vst.msk [vmem:[#allocation0] ss:$8 sm:$0x3] %vm11_vm1, %v10_v10  }
  0x7c   :  { %v17_v12 = vpop.permute.xlu0 %16   ;;  %v31_v13 = vpop.permute.xlu1 %30  }
  0x7d   :  { %19 = vst.msk [vmem:[#allocation0] ss:$8 sm:$0x3] %vm18_vm2, %v17_v12  }
  0x7e   :  { %26 = vst.msk [vmem:[#allocation0] ss:$8 sm:$0x3] %vm25_vm3, %v24_v11  }
  0x7f   :  { %33 = vst.msk [vmem:[#allocation0] ss:$8 sm:$0x3] %vm32_vm4, %v31_v13  }
  0x80   :  { %40 = vst.msk [vmem:[#allocation0] ss:$8 sm:$0x3] %vm39_vm5, %v38_v8  }
  0x81   :  { %47 = vst.msk [vmem:[#allocation0] ss:$8 sm:$0x3] %vm46_vm6, %v45_v9  }
  0x84   :  { %v52_v14 = vpop.permute.xlu0 %51  }
  0x85   :  { %54 = vst.msk [vmem:[#allocation0] ss:$8 sm:$0x3] %vm53_vm7, %v52_v14  }
  0x8c   :  { %v57_v15 = vld [vmem:[#allocation0] sm:$0x1]  ;;  %v62_v16 = vld [vmem:[#allocation0 + $0x8] sm:$0x1] }
  0x8d   :  { %60 = vst [vmem:[%s130_s1] sm:$0x1] %v57_v15 }
  0x8e   :  { %74 = vst [vmem:[%s130_s1 + $0x1] sm:$0x1] %v62_v16 }

// kernel: dsnt_forward.1
= control target key start
LH: loop header
LB: loop body
LE: loop exit
PB: predicated region body
PF: predicated region fallthrough
CT: control target
= control target key end

     0   :  { %vm85_vm0 = vcmask 15360   ;;  %s211_s1 = inlined_call_operand.vmem [shape: f32[256,2], index: 1, kind: input, shape index: {}]   ;;  %s212_s0 = inlined_call_operand.vmem [shape: f32[8,256], index: 0, kind: input, shape index: {}]   ;;  %s213_s2 = inlined_call_operand.vmem [shape: f32[8,2], index: 2, kind: output, shape index: {}]  }
   0x1   :  { %v28_v0 = vld [vmem:[%s211_s1 + $0x78] sm:$0xff]  ;;  %v27_v2 = vld [vmem:[%s211_s1 + $0x70] sm:$0xff]  ;;  %v26_v4 = vld [vmem:[%s211_s1 + $0x68] sm:$0xff] }
   0x2   :  { %v44_v1 = vld [vmem:[%s211_s1 + $0xf8] sm:$0xff]  ;;  %45 = vmatpush.msra.mxu0 %v28_v0  ;;  %v43_v3 = vld [vmem:[%s211_s1 + $0xf0] sm:$0xff]  ;;  %v42_v5 = vld [vmem:[%s211_s1 + $0xe8] sm:$0xff] }
   0x3   :  { %65 = vmatpush.msra.mxu1 %v44_v1  ;;  %v25_v6 = vld [vmem:[%s211_s1 + $0x60] sm:$0xff]  ;;  %v24_v8 = vld [vmem:[%s211_s1 + $0x58] sm:$0xff]  ;;  %v23_v10 = vld [vmem:[%s211_s1 + $0x50] sm:$0xff] }
   0x4   :  { %46 = vmatpush.msra.mxu0 %v27_v2  ;;  %v41_v7 = vld [vmem:[%s211_s1 + $0xe0] sm:$0xff]  ;;  %v40_v9 = vld [vmem:[%s211_s1 + $0xd8] sm:$0xff]  ;;  %v39_v11 = vld [vmem:[%s211_s1 + $0xd0] sm:$0xff] }
   0x5   :  { %66 = vmatpush.msra.mxu1 %v43_v3  ;;  %v22_v12 = vld [vmem:[%s211_s1 + $0x48] sm:$0xff]  ;;  %v21_v14 = vld [vmem:[%s211_s1 + $0x40] sm:$0xff]  ;;  %v20_v16 = vld [vmem:[%s211_s1 + $0x38] sm:$0xff] }
   0x6   :  { %47 = vmatpush.msra.mxu0 %v26_v4  ;;  %v38_v13 = vld [vmem:[%s211_s1 + $0xc8] sm:$0xff]  ;;  %v37_v15 = vld [vmem:[%s211_s1 + $0xc0] sm:$0xff]  ;;  %v36_v17 = vld [vmem:[%s211_s1 + $0xb8] sm:$0xff] }
   0x7   :  { %67 = vmatpush.msra.mxu1 %v42_v5  ;;  %v19_v18 = vld [vmem:[%s211_s1 + $0x30] sm:$0xff]  ;;  %v18_v20 = vld [vmem:[%s211_s1 + $0x28] sm:$0xff]  ;;  %v17_v22 = vld [vmem:[%s211_s1 + $0x20] sm:$0xff] }
   0x8   :  { %48 = vmatpush.msra.mxu0 %v25_v6  ;;  %v35_v19 = vld [vmem:[%s211_s1 + $0xb0] sm:$0xff]  ;;  %v34_v21 = vld [vmem:[%s211_s1 + $0xa8] sm:$0xff]  ;;  %v33_v23 = vld [vmem:[%s211_s1 + $0xa0] sm:$0xff] }
   0x9   :  { %68 = vmatpush.msra.mxu1 %v41_v7  ;;  %v16_v24 = vld [vmem:[%s211_s1 + $0x18] sm:$0xff]  ;;  %v15_v26 = vld [vmem:[%s211_s1 + $0x10] sm:$0xff]  ;;  %v14_v28 = vld [vmem:[%s211_s1 + $0x8] sm:$0xff] }
   0xa   :  { %49 = vmatpush.msra.mxu0 %v24_v8  ;;  %v32_v25 = vld [vmem:[%s211_s1 + $0x98] sm:$0xff]  ;;  %v31_v27 = vld [vmem:[%s211_s1 + $0x90] sm:$0xff]  ;;  %v30_v29 = vld [vmem:[%s211_s1 + $0x88] sm:$0xff] }
   0xb   :  { %69 = vmatpush.msra.mxu1 %v40_v9  ;;  %v13_v30 = vld [vmem:[%s211_s1] sm:$0xff]  ;;  %v12_v33 = vld [vmem:[%s212_s0 + $0x8] sm:$0xff] }
   0xc   :  { %50 = vmatpush.msra.mxu0 %v23_v10  ;;  %v29_v31 = vld [vmem:[%s211_s1 + $0x80] sm:$0xff] }
   0xd   :  { %70 = vmatpush.msra.mxu1 %v39_v11  ;;  %v11_v32 = vld [vmem:[%s212_s0] sm:$0xff] }
   0xe   :  { %51 = vmatpush.msra.mxu0 %v22_v12 }
   0xf   :  { %71 = vmatpush.msra.mxu1 %v38_v13 }
  0x10   :  { %52 = vmatpush.msra.mxu0 %v21_v14 }
  0x11   :  { %72 = vmatpush.msra.mxu1 %v37_v15 }
  0x12   :  { %53 = vmatpush.msra.mxu0 %v20_v16 }
  0x13   :  { %73 = vmatpush.msra.mxu1 %v36_v17 }
  0x14   :  { %54 = vmatpush.msra.mxu0 %v19_v18 }
  0x15   :  { %74 = vmatpush.msra.mxu1 %v35_v19 }
  0x16   :  { %55 = vmatpush.msra.mxu0 %v18_v20 }
  0x17   :  { %75 = vmatpush.msra.mxu1 %v34_v21 }
  0x18   :  { %56 = vmatpush.msra.mxu0 %v17_v22 }
  0x19   :  { %76 = vmatpush.msra.mxu1 %v33_v23 }
  0x1a   :  { %57 = vmatpush.msra.mxu0 %v16_v24 }
  0x1b   :  { %77 = vmatpush.msra.mxu1 %v32_v25 }
  0x1c   :  { %58 = vmatpush.msra.mxu0 %v15_v26 }
  0x1d   :  { %78 = vmatpush.msra.mxu1 %v31_v27 }
  0x1e   :  { %59 = vmatpush.msra.mxu0 %v14_v28 }
  0x1f   :  { %79 = vmatpush.msra.mxu1 %v30_v29 }
  0x20   :  { %60 = vmatpush.msra.mxu0 %v13_v30 }
  0x21   :  { %80 = vmatpush.msra.mxu1 %v29_v31  ;;  %61 = vmatmul.f32.vlgmr.msra.gmra.mxu0 %v11_v32 }
  0x22   :  { %81 = vmatmul.f32.vlgmr.msra.gmra.mxu1 %v12_v33 }
  0x9e   :  { %v62_v34 = vpop.f32.mrf.mxu0 }
  0x9f   :  { %v82_v35 = vpop.f32.mrf.mxu1 }
  0xa0   :  { %v83_v36 = vadd.f32 %v82_v35, %v62_v34 }
  0xa2   :  { %86 = vst.msk [vmem:[%s213_s2] sm:$0xff] %vm85_vm0, %v83_v36 }

</bundles_post_ra>
